<compile_context>
chip_gen: v7x
topology: tpu7x:2x2x1
jax: 0.10.0
libtpu: 0.0.40
codegen_flags: <defaults>
</compile_context>

<pallas_src>
from typing import NamedTuple, Optional

import numpy as np
import jax
import jax.numpy as jnp
from jax.experimental import pallas as pl
from jax.experimental.pallas import tpu as pltpu


def _round_up(x, m):
    return (x + m - 1) // m * m


class PackedHighwayParams(NamedTuple):
    wx: Optional[jax.Array]   # (Kx_pad, n_j*3*tn) bf16/f32, None if not first layer
    wr: jax.Array             # (H_pad,  n_j*3*tn)
    b: jax.Array              # (1,      n_j*3*tn) f32, pre-summed b_W + b_R
    first_layer: bool
    input_size: int
    hidden_size: int
    kx_pad: int
    h_pad: int
    gate_tile: int            # tn (per-gate output columns per j tile)


# ---------------------------------------------------------------------------
# Kernels.  Grid = (n_j, n_i); j (hidden tile) is the OUTER axis so the weight
# slab block index is constant across the inner batch loop -> fetched once and
# kept VMEM-resident.  No reduction grid axis: one fused dot per tile.
#   x_ref     : (tm, Kx_pad)      input activations (first layer only)
#   hfull_ref : (tm, H_pad)       prev hidden, full width (for R contraction)
#   hj_ref    : (tm, tn)          prev hidden, j-th tile (for the h*cl term)
#   wx_ref    : (Kx_pad, 3*tn)    gate-interleaved W slab for this j
#   wr_ref    : (H_pad,  3*tn)    gate-interleaved R slab for this j
#   b_ref     : (1, 3*tn)         pre-summed biases for this j
#   out_ref   : (tm, tn)
# ---------------------------------------------------------------------------
def _highway_first_kernel(x_ref, hfull_ref, hj_ref, wx_ref, wr_ref, b_ref, out_ref):
    tn = out_ref.shape[1]
    cdt = wr_ref.dtype
    acc = jnp.dot(x_ref[...].astype(cdt), wx_ref[...],
                  preferred_element_type=jnp.float32)
    acc = acc + jnp.dot(hfull_ref[...].astype(cdt), wr_ref[...],
                        preferred_element_type=jnp.float32)
    acc = acc + b_ref[...].astype(jnp.float32)
    hl = acc[:, :tn]
    tl = acc[:, tn:2 * tn]
    cl = acc[:, 2 * tn:]
    h_j = hj_ref[...].astype(jnp.float32)
    out_ref[...] = (hl * tl + h_j * cl).astype(out_ref.dtype)


def _highway_rec_kernel(hfull_ref, hj_ref, wr_ref, b_ref, out_ref):
    tn = out_ref.shape[1]
    cdt = wr_ref.dtype
    acc = jnp.dot(hfull_ref[...].astype(cdt), wr_ref[...],
                  preferred_element_type=jnp.float32)
    acc = acc + b_ref[...].astype(jnp.float32)
    hl = acc[:, :tn]
    tl = acc[:, tn:2 * tn]
    cl = acc[:, 2 * tn:]
    h_j = hj_ref[...].astype(jnp.float32)
    out_ref[...] = (hl * tl + h_j * cl).astype(out_ref.dtype)


# ---------------------------------------------------------------------------
# One-time parameter packing (run OUTSIDE the per-step recurrence).
# ---------------------------------------------------------------------------
def _choose_gate_tile(h_pad, k_total_pad, weight_itemsize,
                      budget_bytes=10 * 2**20):
    """Per-gate output columns per j tile (multiple of 128)."""
    tn = 128
    for cand in (512, 256, 128):
        # 2x for double-buffered weight slab (Wx + Wr fused rows = k_total_pad)
        if h_pad % cand == 0 and 2 * k_total_pad * 3 * cand * weight_itemsize <= budget_bytes:
            tn = cand
            break
    # v7x megacore: when batch is small the j axis is the only parallel axis;
    # keep >= 2 j tiles as long as that keeps tn at the 256-wide MXU sweet spot.
    if tn == h_pad and tn >= 512:
        tn //= 2
    return tn


def pack_highway_params(params, *, first_layer, weight_dtype=jnp.bfloat16,
                        gate_tile=None):
    """Pack per-gate nn.Linear params (dict name -> (weight, bias), torch
    layout weight=(out,in)) into fused, gate-interleaved, lane-padded slabs.

    Gate order follows HighwayBlock.forward exactly:
      gate 0 (hl): W_H / R_H, gate 1 (tl): W_C / R_C, gate 2 (cl): W_T / R_T.
    """
    gates = (("W_H", "R_H"), ("W_C", "R_C"), ("W_T", "R_T"))
    hidden = params["R_H"][0].shape[0]
    input_size = params["W_H"][0].shape[1] if first_layer else 0

    h_pad = _round_up(hidden, 128)
    kx_pad = _round_up(input_size, 128) if first_layer else 0

    def pad_w(w_act_major, k, k_pad):
        # w_act_major: (k, hidden) "activation @ w" layout
        return jnp.pad(w_act_major, ((0, k_pad - k), (0, h_pad - hidden)))

    wr_g, wx_g, b_g = [], [], []
    for wname, rname in gates:
        r_w, r_b = params[rname]                       # (hidden, hidden), (hidden,)
        wr_g.append(pad_w(r_w.T, hidden, h_pad))
        bias = r_b
        if first_layer:
            w_w, w_b = params[wname]                   # (hidden, input), (hidden,)
            wx_g.append(pad_w(w_w.T, input_size, kx_pad))
            bias = bias + w_b                          # pre-sum biases
        b_g.append(jnp.pad(bias, (0, h_pad - hidden)))

    if gate_tile is None:
        itemsize = np.dtype(weight_dtype).itemsize
        gate_tile = _choose_gate_tile(h_pad, kx_pad + h_pad, itemsize)
    tn = gate_tile
    assert h_pad % tn == 0 and tn % 128 == 0
    n_j = h_pad // tn

    def interleave(stack):                             # (3, K_pad, h_pad)
        k_pad = stack.shape[1]
        w = stack.reshape(3, k_pad, n_j, tn)
        w = jnp.transpose(w, (1, 2, 0, 3))             # (K_pad, n_j, 3, tn)
        return w.reshape(k_pad, n_j * 3 * tn)

    wr = interleave(jnp.stack(wr_g)).astype(weight_dtype)
    wx = interleave(jnp.stack(wx_g)).astype(weight_dtype) if first_layer else None
    b = jnp.stack(b_g).reshape(3, n_j, tn)
    b = jnp.transpose(b, (1, 0, 2)).reshape(1, n_j * 3 * tn).astype(jnp.float32)

    return PackedHighwayParams(wx=wx, wr=wr, b=b, first_layer=first_layer,
                               input_size=input_size, hidden_size=hidden,
                               kx_pad=kx_pad, h_pad=h_pad, gate_tile=tn)


# ---------------------------------------------------------------------------
# Wrapper
# ---------------------------------------------------------------------------
def highway_block(x, prev_hidden, packed: PackedHighwayParams):
    """Pallas implementation of HighwayBlock.forward with packed params."""
    first = packed.first_layer
    if first:
        if x is None:
            raise ValueError("packed params were built with first_layer=True; "
                             "an input tensor x is required.")
        if x.shape[1] != packed.input_size:
            raise ValueError(f"x has {x.shape[1]} features, packed params "
                             f"expect {packed.input_size}.")
    elif x is not None:
        raise ValueError("packed params were built with first_layer=False; "
                         "pass x=None.")

    B, H = prev_hidden.shape
    if H != packed.hidden_size:
        raise ValueError(f"prev_hidden has {H} features, expected {packed.hidden_size}.")

    H_pad, tn = packed.h_pad, packed.gate_tile
    n_j = H_pad // tn

    B_pad = _round_up(B, 8)
    tm = next(c for c in (256, 128, 64, 32, 16, 8) if B_pad % c == 0)
    n_i = B_pad // tm

    # Pad activations only when needed (static shapes -> no op when aligned).
    # TODO(synk): inside a real recurrence, pre-pad x/h once per sequence so
    # these pads never appear on the per-timestep path.
    h_in = prev_hidden
    if (B_pad, H_pad) != (B, H):
        h_in = jnp.pad(prev_hidden, ((0, B_pad - B), (0, H_pad - H)))

    if first:
        kx_pad = packed.kx_pad
        x_in = x
        if (B_pad, kx_pad) != x.shape:
            x_in = jnp.pad(x, ((0, B_pad - B), (0, kx_pad - x.shape[1])))
        args = (x_in, h_in, h_in, packed.wx, packed.wr, packed.b)
        in_specs = [
            pl.BlockSpec((tm, kx_pad), lambda j, i: (i, 0)),        # x
            pl.BlockSpec((tm, H_pad), lambda j, i: (i, 0)),         # h (full width)
            pl.BlockSpec((tm, tn), lambda j, i: (i, j)),            # h (carry tile)
            pl.BlockSpec((kx_pad, 3 * tn), lambda j, i: (0, j)),    # W slab (resident over i)
            pl.BlockSpec((H_pad, 3 * tn), lambda j, i: (0, j)),     # R slab (resident over i)
            pl.BlockSpec((1, 3 * tn), lambda j, i: (0, j)),         # bias
        ]
        kernel = _highway_first_kernel
        k_total_pad = kx_pad + H_pad
    else:
        args = (h_in, h_in, packed.wr, packed.b)
        in_specs = [
            pl.BlockSpec((tm, H_pad), lambda j, i: (i, 0)),
            pl.BlockSpec((tm, tn), lambda j, i: (i, j)),
            pl.BlockSpec((H_pad, 3 * tn), lambda j, i: (0, j)),
            pl.BlockSpec((1, 3 * tn), lambda j, i: (0, j)),
        ]
        kernel = _highway_rec_kernel
        k_total_pad = H_pad

    # Rough VMEM budget: resident weight slabs (double-buffered) + activation /
    # output tiles + live f32 accumulator.  Clamp to stay inside v7x's 64 MiB
    # physical VMEM while overriding v5e's 16 MiB default scoped limit.
    wbytes = packed.wr.dtype.itemsize
    abytes = prev_hidden.dtype.itemsize
    vmem_est = 2 * k_total_pad * 3 * tn * wbytes
    vmem_est += 2 * (tm * k_total_pad + tm * tn) * abytes
    vmem_est += 2 * tm * tn * abytes
    vmem_est += tm * 3 * tn * 4
    vmem_limit = int(min(max(2 * vmem_est, 32 * 2**20), 48 * 2**20))

    out_dtype = prev_hidden.dtype
    bytes_accessed = sum(int(a.size) * a.dtype.itemsize for a in args)
    bytes_accessed += int(B_pad * H_pad) * out_dtype.itemsize
    cost = pl.CostEstimate(flops=int(2 * B_pad * k_total_pad * 3 * H_pad),
                           transcendentals=0,
                           bytes_accessed=int(bytes_accessed))

    out = pl.pallas_call(
        kernel,
        out_shape=jax.ShapeDtypeStruct((B_pad, H_pad), out_dtype),
        grid_spec=pltpu.PrefetchScalarGridSpec(
            num_scalar_prefetch=0,
            grid=(n_j, n_i),                       # j outer -> weights resident over i
            in_specs=in_specs,
            out_specs=pl.BlockSpec((tm, tn), lambda j, i: (i, j)),
        ),
        compiler_params=pltpu.CompilerParams(
            dimension_semantics=("parallel", "parallel"),
            vmem_limit_bytes=vmem_limit,
        ),
        cost_estimate=cost,
    )(*args)

    return out[:B, :H]


# ---------------------------------------------------------------------------
# Pure-JAX reference mirroring the PyTorch forward exactly.
# ---------------------------------------------------------------------------
def _ref_highway(x, h, params, *, first_layer, compute_dtype=jnp.float32):
    prec = (jax.lax.Precision.HIGHEST if compute_dtype == jnp.float32
            else jax.lax.Precision.DEFAULT)

    def lin(p, a):
        w, b = p
        return jnp.dot(a.astype(compute_dtype), w.T.astype(compute_dtype),
                       preferred_element_type=jnp.float32, precision=prec) + b

    if first_layer:
        hl = lin(params["W_H"], x) + lin(params["R_H"], h)
        tl = lin(params["W_C"], x) + lin(params["R_C"], h)
        cl = lin(params["W_T"], x) + lin(params["R_T"], h)
    else:
        hl = lin(params["R_H"], h)
        tl = lin(params["R_C"], h)
        cl = lin(params["R_T"], h)
    return hl * tl + h.astype(jnp.float32) * cl


def _init_params(key, input_size, hidden_size):
    names_shapes = [
        ("W_H", (hidden_size, input_size)),
        ("W_T", (hidden_size, input_size)),
        ("W_C", (hidden_size, input_size)),
        ("R_H", (hidden_size, hidden_size)),
        ("R_T", (hidden_size, hidden_size)),
        ("R_C", (hidden_size, hidden_size)),
    ]
    params = {}
    for name, shape in names_shapes:
        key, kw, kb = jax.random.split(key, 3)
        bound = 1.0 / (shape[1] ** 0.5)            # nn.Linear default init range
        w = jax.random.uniform(kw, shape, jnp.float32, -bound, bound)
        b = jax.random.uniform(kb, (shape[0],), jnp.float32, -bound, bound)
        params[name] = (w, b)
    return params


if __name__ == "__main__":
    key = jax.random.PRNGKey(0)
    kx, kh, kp, kx2, kh2, kp2 = jax.random.split(key, 6)

    # ---------------- small shapes (single-tile path) ----------------------
    B, INPUT, HIDDEN = 4, 24, 48
    x = jax.random.normal(kx, (B, INPUT), jnp.float32)
    h = jax.random.normal(kh, (B, HIDDEN), jnp.float32)
    params = _init_params(kp, INPUT, HIDDEN)

    # f32 weights: tight numerical check of the tiling / fusion / packing path
    p32 = pack_highway_params(params, first_layer=True, weight_dtype=jnp.float32)
    out32 = jax.block_until_ready(highway_block(x, h, p32))
    ref32 = _ref_highway(x, h, params, first_layer=True)
    assert out32.shape == (B, HIDDEN)
    assert jnp.allclose(out32, ref32, atol=1e-3, rtol=1e-3)

    # bf16 weights (default perf path): check against a dtype-matched reference
    pbf = pack_highway_params(params, first_layer=True)
    outbf = jax.block_until_ready(highway_block(x, h, pbf))
    refbf = _ref_highway(x, h, params, first_layer=True, compute_dtype=jnp.bfloat16)
    assert jnp.allclose(outbf, refbf, atol=2e-3, rtol=2e-3)
    assert jnp.allclose(outbf, ref32, atol=6e-2, rtol=6e-2)   # quantization sanity

    # recurrent (first_layer=False) path
    pr32 = pack_highway_params(params, first_layer=False, weight_dtype=jnp.float32)
    outr = jax.block_until_ready(highway_block(None, h, pr32))
    refr = _ref_highway(None, h, params, first_layer=False)
    assert jnp.allclose(outr, refr, atol=1e-3, rtol=1e-3)

    # ------------- larger shapes: multiple batch and hidden tiles ----------
    B2, IN2, H2 = 24, 200, 320      # B_pad=24 (3 i tiles), H_pad=384 (3 j tiles)
    x2 = jax.random.normal(kx2, (B2, IN2), jnp.float32)
    h2 = jax.random.normal(kh2, (B2, H2), jnp.float32)
    params2 = _init_params(kp2, IN2, H2)

    p2_32 = pack_highway_params(params2, first_layer=True, weight_dtype=jnp.float32)
    out2 = jax.block_until_ready(highway_block(x2, h2, p2_32))
    ref2 = _ref_highway(x2, h2, params2, first_layer=True)
    assert out2.shape == (B2, H2)
    assert jnp.allclose(out2, ref2, atol=2e-3, rtol=2e-3)

    p2_bf = pack_highway_params(params2, first_layer=True)
    out2bf = jax.block_until_ready(highway_block(x2, h2, p2_bf))
    ref2bf = _ref_highway(x2, h2, params2, first_layer=True, compute_dtype=jnp.bfloat16)
    assert jnp.allclose(out2bf, ref2bf, atol=3e-3, rtol=3e-3)

    p2_rec = pack_highway_params(params2, first_layer=False)
    out2r = jax.block_until_ready(highway_block(None, h2, p2_rec))
    ref2r = _ref_highway(None, h2, params2, first_layer=False, compute_dtype=jnp.bfloat16)
    assert jnp.allclose(out2r, ref2r, atol=3e-3, rtol=3e-3)

    print("KERNEL_OK")
</pallas_src>

<mosaic_0001>
module attributes {stable_mosaic.version = 11 : i64} {
  func.func @_highway_first_kernel(%arg0: i32, %arg1: i32, %arg2: memref<8x128xf32, #tpu.memory_space<vmem>>, %arg3: memref<8x128xf32, #tpu.memory_space<vmem>>, %arg4: memref<8x128xf32, #tpu.memory_space<vmem>>, %arg5: memref<128x384xf32, #tpu.memory_space<vmem>>, %arg6: memref<128x384xf32, #tpu.memory_space<vmem>>, %arg7: memref<1x384xf32, #tpu.memory_space<vmem>>, %arg8: memref<8x128xf32, #tpu.memory_space<vmem>>) attributes {dimension_semantics = [#tpu.dimension_semantics<parallel>, #tpu.dimension_semantics<parallel>], iteration_bounds = array<i64: 1, 1>, scalar_prefetch = 0 : i64, scratch_operands = 0 : i64, tpu.core_type = #tpu.core_type<tc>, window_params = [{transform_indices = @transform_0, window_bounds = array<i64: 8, 128>}, {transform_indices = @transform_1, window_bounds = array<i64: 8, 128>}, {transform_indices = @transform_2, window_bounds = array<i64: 8, 128>}, {transform_indices = @transform_3, window_bounds = array<i64: 128, 384>}, {transform_indices = @transform_4, window_bounds = array<i64: 128, 384>}, {transform_indices = @transform_5, window_bounds = array<i64: 1, 384>}, {transform_indices = @transform_6, window_bounds = array<i64: 8, 128>}]} {
    %c0 = arith.constant 0 : index
    %c0_0 = arith.constant 0 : index
    %0 = vector.load %arg2[%c0, %c0_0] : memref<8x128xf32, #tpu.memory_space<vmem>>, vector<8x128xf32>
    %c0_1 = arith.constant 0 : index
    %c0_2 = arith.constant 0 : index
    %1 = vector.load %arg5[%c0_1, %c0_2] : memref<128x384xf32, #tpu.memory_space<vmem>>, vector<128x384xf32>
    %cst = arith.constant dense<0.000000e+00> : vector<8x384xf32>
    %2 = tpu.matmul %0, %1, %cst {dimension_numbers = #tpu.dot_dimension_numbers<[1], [0], [0], [1], [0, 0, 1, 1], [], []>} : vector<8x128xf32>, vector<128x384xf32>, vector<8x384xf32> -> vector<8x384xf32>
    %c0_3 = arith.constant 0 : index
    %c0_4 = arith.constant 0 : index
    %3 = vector.load %arg3[%c0_3, %c0_4] : memref<8x128xf32, #tpu.memory_space<vmem>>, vector<8x128xf32>
    %c0_5 = arith.constant 0 : index
    %c0_6 = arith.constant 0 : index
    %4 = vector.load %arg6[%c0_5, %c0_6] : memref<128x384xf32, #tpu.memory_space<vmem>>, vector<128x384xf32>
    %cst_7 = arith.constant dense<0.000000e+00> : vector<8x384xf32>
    %5 = tpu.matmul %3, %4, %cst_7 {dimension_numbers = #tpu.dot_dimension_numbers<[1], [0], [0], [1], [0, 0, 1, 1], [], []>} : vector<8x128xf32>, vector<128x384xf32>, vector<8x384xf32> -> vector<8x384xf32>
    %6 = arith.addf %2, %5 : vector<8x384xf32>
    %c0_8 = arith.constant 0 : index
    %c0_9 = arith.constant 0 : index
    %7 = vector.load %arg7[%c0_8, %c0_9] : memref<1x384xf32, #tpu.memory_space<vmem>>, vector<1x384xf32>
    %8 = vector.broadcast %7 : vector<1x384xf32> to vector<8x384xf32>
    %9 = arith.addf %6, %8 : vector<8x384xf32>
    %10 = vector.extract_strided_slice %9 {offsets = [0, 0], sizes = [8, 128], strides = [1, 1]} : vector<8x384xf32> to vector<8x128xf32>
    %11 = vector.extract_strided_slice %9 {offsets = [0, 128], sizes = [8, 128], strides = [1, 1]} : vector<8x384xf32> to vector<8x128xf32>
    %12 = vector.extract_strided_slice %9 {offsets = [0, 256], sizes = [8, 128], strides = [1, 1]} : vector<8x384xf32> to vector<8x128xf32>
    %c0_10 = arith.constant 0 : index
    %c0_11 = arith.constant 0 : index
    %13 = vector.load %arg4[%c0_10, %c0_11] : memref<8x128xf32, #tpu.memory_space<vmem>>, vector<8x128xf32>
    %14 = arith.mulf %10, %11 : vector<8x128xf32>
    %15 = arith.mulf %13, %12 : vector<8x128xf32>
    %16 = arith.addf %14, %15 : vector<8x128xf32>
    %c0_12 = arith.constant 0 : index
    %c0_13 = arith.constant 0 : index
    %17 = vector.load %arg8[%c0_12, %c0_13] : memref<8x128xf32, #tpu.memory_space<vmem>>, vector<8x128xf32>
    tpu.vector_store %arg8[%c0_12, %c0_13], %16 {strides = array<i32>} : memref<8x128xf32, #tpu.memory_space<vmem>>, vector<8x128xf32>,
    return
  }
  func.func @transform_0(%arg0: i32, %arg1: i32) -> (i32, i32) {
    %c0_i32 = arith.constant 0 : i32
    %c0_i32_0 = arith.constant 0 : i32
    return %arg1, %c0_i32 : i32, i32
  }
  func.func @transform_1(%arg0: i32, %arg1: i32) -> (i32, i32) {
    %c0_i32 = arith.constant 0 : i32
    %c0_i32_0 = arith.constant 0 : i32
    return %arg1, %c0_i32 : i32, i32
  }
  func.func @transform_2(%arg0: i32, %arg1: i32) -> (i32, i32) {
    %c0_i32 = arith.constant 0 : i32
    return %arg1, %arg0 : i32, i32
  }
  func.func @transform_3(%arg0: i32, %arg1: i32) -> (i32, i32) {
    %c0_i32 = arith.constant 0 : i32
    %c0_i32_0 = arith.constant 0 : i32
    return %c0_i32, %arg0 : i32, i32
  }
  func.func @transform_4(%arg0: i32, %arg1: i32) -> (i32, i32) {
    %c0_i32 = arith.constant 0 : i32
    %c0_i32_0 = arith.constant 0 : i32
    return %c0_i32, %arg0 : i32, i32
  }
  func.func @transform_5(%arg0: i32, %arg1: i32) -> (i32, i32) {
    %c0_i32 = arith.constant 0 : i32
    %c0_i32_0 = arith.constant 0 : i32
    return %c0_i32, %arg0 : i32, i32
  }
  func.func @transform_6(%arg0: i32, %arg1: i32) -> (i32, i32) {
    %c0_i32 = arith.constant 0 : i32
    return %arg1, %arg0 : i32, i32
  }
}

</mosaic_0001>

<bundles_post_ra>
// kernel: tpu_custom_call.1
= control target key start
LH: loop header
LB: loop body
LE: loop exit
PB: predicated region body
PF: predicated region fallthrough
CT: control target
= control target key end

     0   :  { %11 = vsyncpa [#allocation3], 0  ;;  %s1033_s0 = inlined_call_operand.hbm [shape: f32[8,128], index: 0, kind: input, shape index: {}]   ;;  %s1034_s1 = inlined_call_operand.hbm [shape: f32[8,128], index: 1, kind: input, shape index: {}]   ;;  %s1035_s2 = inlined_call_operand.hbm [shape: f32[8,128], index: 2, kind: input, shape index: {}]   ;;  %s1036_s3 = inlined_call_operand.hbm [shape: f32[128,384], index: 3, kind: input, shape index: {}]   ;;  %s1037_s4 = inlined_call_operand.hbm [shape: f32[128,384], index: 4, kind: input, shape index: {}]   ;;  %s1038_s5 = inlined_call_operand.vmem [shape: f32[1,384], index: 5, kind: input, shape index: {}]   ;;  %s1039_s6 = inlined_call_operand.hbm [shape: f32[8,128], index: 6, kind: output, shape index: {}]  }
   0x1   :  { %12 = vsyncpa [#allocation6], 0 }
   0x2   :  { %13 = vsyncpa [#allocation9], 0 }
   0x3   :  { %14 = vsyncpa [#allocation4], 0  ;;  %s877_s21 = smov [#allocation5]   ;;  %s878_s23 = smov [#allocation8]  }
   0x4   :  { %s31_s22 = sshll.u32 %s877_s21, 4  ;;  %s50_s24 = sshll.u32 %s878_s23, 4  ;;  %s32_s22 = int_to_ptr.vmem [resolvable:$true] %s31_s22  ;;  %s923_s24 = int_to_ptr.vmem [resolvable:$true] %s50_s24 }
   0x5   :  { %s737_s27 = scalar_lea.hbm %s1034_s1, 128 }
   0x6   :  { %p738_p0 = scmp.ne.s32.totalorder %s1034_s1, %s737_s27  ;;  %p741_p1 = scmp.lt.u32.totalorder %s737_s27, %s1034_s1 }
   0x8   :  { %p743_p2 = pnand %p741_p1, %p738_p0 }
   0xa   :  { %746 = shalt.err (!%p743_p2)
}
   0xb   :  { %s747_s8 = scalar_lea.vmem %s32_s22, 128  ;;  %p752_p4 = scmp.lt.s32.totalorder %s32_s22, %s32_s22 }
   0xc   :  { %p748_p3 = scmp.ne.s32.totalorder %s32_s22, %s747_s8  ;;  %p753_p5 = scmp.lt.s32.totalorder %s747_s8, %s747_s8 }
   0xe   :  { %p754_p6 = por %p753_p5, %p752_p4 }
  0x10   :  { %p755_p7 = pnand %p754_p6, %p748_p3 }
  0x12   :  { %758 = shalt.err (!%p755_p7)
}
  0x13   :  { %34 = dma.hbm_to_vmem [thread:$0]  %s1034_s1, 128, %s32_s22, [#allocation6]  }
  0x14   :  { %s759_s13 = scalar_lea.hbm %s1036_s3, 6144 }
  0x15   :  { %p760_p8 = scmp.ne.s32.totalorder %s1036_s3, %s759_s13  ;;  %p763_p9 = scmp.lt.u32.totalorder %s759_s13, %s1036_s3 }
  0x17   :  { %p765_p10 = pnand %p763_p9, %p760_p8 }
  0x19   :  { %768 = shalt.err (!%p765_p10)
}
  0x1a   :  { %s769_s18 = scalar_lea.vmem %s923_s24, 6144  ;;  %p774_p12 = scmp.lt.s32.totalorder %s923_s24, %s923_s24 }
  0x1b   :  { %p770_p11 = scmp.ne.s32.totalorder %s923_s24, %s769_s18  ;;  %p775_p13 = scmp.lt.s32.totalorder %s769_s18, %s769_s18 }
  0x1d   :  { %p776_p0 = por %p775_p13, %p774_p12 }
  0x1f   :  { %p777_p1 = pnand %p776_p0, %p770_p11 }
  0x21   :  { %780 = shalt.err (!%p777_p1)
}
  0x22   :  { %s879_s1 = smov 384   ;;  %s880_s19 = smov 24  }
  0x23   :  { %56 = dma.hbm_to_vmem [thread:$0]  %s1036_s3, 6144, %s923_s24, [#allocation9], %s879_s1, %s879_s1, %s880_s19  }
  0x24   :  { %s881_s22 = smov [#allocation2]   ;;  %s882_s25 = smov [#allocation7]  }
  0x25   :  { %s21_s23 = sshll.u32 %s881_s22, 4  ;;  %s41_s26 = sshll.u32 %s882_s25, 4  ;;  %s22_s23 = int_to_ptr.vmem [resolvable:$true] %s21_s23  ;;  %s42_s26 = int_to_ptr.vmem [resolvable:$true] %s41_s26 }
  0x26   :  { %s781_s29 = scalar_lea.hbm %s1033_s0, 128 }
  0x27   :  { %p782_p2 = scmp.ne.s32.totalorder %s1033_s0, %s781_s29  ;;  %p785_p3 = scmp.lt.u32.totalorder %s781_s29, %s1033_s0 }
  0x29   :  { %p787_p4 = pnand %p785_p3, %p782_p2 }
  0x2b   :  { %790 = shalt.err (!%p787_p4)
}
  0x2c   :  { %s791_s3 = scalar_lea.vmem %s22_s23, 128  ;;  %p796_p6 = scmp.lt.s32.totalorder %s22_s23, %s22_s23 }
  0x2d   :  { %p792_p5 = scmp.ne.s32.totalorder %s22_s23, %s791_s3  ;;  %p797_p7 = scmp.lt.s32.totalorder %s791_s3, %s791_s3 }
  0x2f   :  { %p798_p8 = por %p797_p7, %p796_p6 }
  0x31   :  { %p799_p9 = pnand %p798_p8, %p792_p5 }
  0x33   :  { %802 = shalt.err (!%p799_p9)
}
  0x34   :  { %24 = dma.hbm_to_vmem [thread:$0]  %s1033_s0, 128, %s22_s23, [#allocation3]  }
  0x35   :  { %s803_s13 = scalar_lea.hbm %s1035_s2, 128 }
  0x36   :  { %p804_p10 = scmp.ne.s32.totalorder %s1035_s2, %s803_s13  ;;  %p807_p11 = scmp.lt.u32.totalorder %s803_s13, %s1035_s2 }
  0x38   :  { %p809_p12 = pnand %p807_p11, %p804_p10 }
  0x3a   :  { %812 = shalt.err (!%p809_p12)
}
  0x3b   :  { %s813_s18 = scalar_lea.vmem %s42_s26, 128  ;;  %p818_p0 = scmp.lt.s32.totalorder %s42_s26, %s42_s26 }
  0x3c   :  { %p814_p13 = scmp.ne.s32.totalorder %s42_s26, %s813_s18  ;;  %p819_p1 = scmp.lt.s32.totalorder %s813_s18, %s813_s18 }
  0x3e   :  { %p820_p2 = por %p819_p1, %p818_p0 }
  0x40   :  { %p821_p3 = pnand %p820_p2, %p814_p13 }
  0x42   :  { %824 = shalt.err (!%p821_p3)
}
  0x43   :  { %44 = dma.hbm_to_vmem [thread:$0]  %s1035_s2, 128, %s42_s26, [#allocation6]  }
  0x44   :  { %s883_s21 = smov [#allocation10]   ;;  %s825_s27 = scalar_lea.hbm %s1037_s4, 6144 }
  0x45   :  { %s62_s22 = sshll.u32 %s883_s21, 4  ;;  %p826_p4 = scmp.ne.s32.totalorder %s1037_s4, %s825_s27  ;;  %s63_s22 = int_to_ptr.vmem [resolvable:$true] %s62_s22 }
  0x46   :  { %p829_p5 = scmp.lt.u32.totalorder %s825_s27, %s1037_s4 }
  0x48   :  { %p831_p6 = pnand %p829_p5, %p826_p4 }
  0x4a   :  { %834 = shalt.err (!%p831_p6)
}
  0x4b   :  { %s835_s8 = scalar_lea.vmem %s63_s22, 6144  ;;  %p840_p8 = scmp.lt.s32.totalorder %s63_s22, %s63_s22 }
  0x4c   :  { %p836_p7 = scmp.ne.s32.totalorder %s63_s22, %s835_s8  ;;  %p841_p9 = scmp.lt.s32.totalorder %s835_s8, %s835_s8 }
  0x4e   :  { %p842_p10 = por %p841_p9, %p840_p8 }
  0x50   :  { %p843_p11 = pnand %p842_p10, %p836_p7 }
  0x52   :  { %846 = shalt.err (!%p843_p11)
}
  0x53   :  { %68 = dma.hbm_to_vmem [thread:$0]  %s1037_s4, 6144, %s63_s22, [#allocation9], %s879_s1, %s879_s1, %s880_s19  }
  0x54   :  { %869 = dma.done.wait [#allocation3], 128  }
  0x55   :  { %870 = vsyncadd [#allocation3], 4294967168 }
  0x56   :  { %871 = dma.done.wait [#allocation6], 256  }
  0x57   :  { %872 = vsyncadd [#allocation6], 4294967040 }
  0x58   :  { %873 = dma.done.wait [#allocation9], 12288  }
  0x59   :  { %874 = vsyncadd [#allocation9], 4294955008  ;;  %v884_v0 = vmov 0.0|0.0   ;;  %vm885_vm0 = vmmov 0   ;;  %v886_v1 = vmov 0.0   ;;  %v137_v2 = vld [vmem:[#allocation10 + $0x8] sm:$0xff] }
  0x5a   :  { %644 = vmatprep.subr.bf16.mxu1 %v884_v0  ;;  %574 = vmatprep.mubr.msk.f32.mxu1 %vm885_vm0, %v886_v1  ;;  %v140_v3 = vld [vmem:[#allocation10 + $0x20] sm:$0xff]  ;;  %v138_v4 = vld [vmem:[#allocation10 + $0x10] sm:$0xff]  ;;  %v141_v6 = vld [vmem:[#allocation10 + $0x28] sm:$0xff]  ;;  %s887_s19 = smov [#allocation11]  }
  0x5b   :  { %248 = vmatprep.mubr.f32.mxu0 %v886_v1  ;;  %v612_v5 = vpack.c.bf16 %v140_v3, %v137_v2  ;;  %v136_v7 = vld [vmem:[#allocation10] sm:$0xff]  ;;  %v139_v8 = vld [vmem:[#allocation10 + $0x18] sm:$0xff]  ;;  %v645_v9 = vpack.c.bf16 %v141_v6, %v138_v4  ;;  %v146_v12 = vld [vmem:[#allocation10 + $0x50] sm:$0xff]  ;;  %s497_s9 = sshll.u32 %s887_s19, 4  ;;  %s498_s9 = int_to_ptr.vmem [resolvable:$true] %s497_s9 }
  0x5c   :  { %v614_v10 = vpack.c.bf16 %v139_v8, %v136_v7  ;;  %v143_v11 = vld [vmem:[#allocation10 + $0x38] sm:$0xff]  ;;  %v144_v13 = vld [vmem:[#allocation10 + $0x40] sm:$0xff]  ;;  %v142_v16 = vld [vmem:[#allocation10 + $0x30] sm:$0xff]  ;;  %p852_p13 = scmp.lt.s32.totalorder %s498_s9, %s498_s9 }
  0x5d   :  { %613 = vmatprep.subr.bf16.mxu0 %v612_v5  ;;  %v616_v14 = vpack.c.bf16 %v146_v12, %v143_v11  ;;  %v147_v15 = vld [vmem:[#allocation10 + $0x58] sm:$0xff]  ;;  %v145_v17 = vld [vmem:[#allocation10 + $0x48] sm:$0xff]  ;;  %646 = vmatpush3.bf16.msra.mxu1 %v645_v9  ;;  %v152_v21 = vld [vmem:[#allocation10 + $0x80] sm:$0xff] }
  0x5e   :  { %615 = vmatpush1.bf16.msra.mxu0 %v614_v10  ;;  %v648_v18 = vpack.c.bf16 %v147_v15, %v144_v13  ;;  %v618_v19 = vpack.c.bf16 %v145_v17, %v142_v16  ;;  %v149_v20 = vld [vmem:[#allocation10 + $0x68] sm:$0xff]  ;;  %v150_v22 = vld [vmem:[#allocation10 + $0x70] sm:$0xff]  ;;  %647 = vmatprep.subr.bf16.mxu1 %v884_v0  ;;  %v148_v25 = vld [vmem:[#allocation10 + $0x60] sm:$0xff] }
  0x5f   :  { %617 = vmatprep.subr.bf16.mxu0 %v616_v14  ;;  %v620_v23 = vpack.c.bf16 %v152_v21, %v149_v20  ;;  %v153_v24 = vld [vmem:[#allocation10 + $0x88] sm:$0xff]  ;;  %v151_v26 = vld [vmem:[#allocation10 + $0x78] sm:$0xff]  ;;  %v158_v28 = vld [vmem:[#allocation10 + $0xb0] sm:$0xff] }
  0x60   :  { %v155_v27 = vld [vmem:[#allocation10 + $0x98] sm:$0xff]  ;;  %v651_v29 = vpack.c.bf16 %v153_v24, %v150_v22  ;;  %v622_v30 = vpack.c.bf16 %v151_v26, %v148_v25  ;;  %v156_v31 = vld [vmem:[#allocation10 + $0xa0] sm:$0xff]  ;;  %v154_v34 = vld [vmem:[#allocation10 + $0x90] sm:$0xff] }
  0x61   :  { %649 = vmatpush3.bf16.msra.mxu1 %v648_v18  ;;  %v624_v32 = vpack.c.bf16 %v158_v28, %v155_v27  ;;  %v159_v33 = vld [vmem:[#allocation10 + $0xb8] sm:$0xff]  ;;  %v157_v35 = vld [vmem:[#allocation10 + $0xa8] sm:$0xff]  ;;  %v164_v37 = vld [vmem:[#allocation10 + $0xe0] sm:$0xff] }
  0x62   :  { %619 = vmatpush1.bf16.msra.mxu0 %v618_v19  ;;  %650 = vmatprep.subr.bf16.mxu1 %v884_v0  ;;  %v161_v36 = vld [vmem:[#allocation10 + $0xc8] sm:$0xff]  ;;  %v654_v38 = vpack.c.bf16 %v159_v33, %v156_v31  ;;  %v626_v39 = vpack.c.bf16 %v157_v35, %v154_v34  ;;  %v162_v40 = vld [vmem:[#allocation10 + $0xd0] sm:$0xff]  ;;  %v160_v43 = vld [vmem:[#allocation10 + $0xc0] sm:$0xff] }
  0x63   :  { %621 = vmatprep.subr.bf16.mxu0 %v620_v23  ;;  %v628_v41 = vpack.c.bf16 %v164_v37, %v161_v36  ;;  %v165_v42 = vld [vmem:[#allocation10 + $0xe8] sm:$0xff]  ;;  %v163_v44 = vld [vmem:[#allocation10 + $0xd8] sm:$0xff]  ;;  %v170_v46 = vld [vmem:[#allocation10 + $0x110] sm:$0xff] }
  0x64   :  { %v167_v45 = vld [vmem:[#allocation10 + $0xf8] sm:$0xff]  ;;  %v657_v47 = vpack.c.bf16 %v165_v42, %v162_v40  ;;  %v630_v48 = vpack.c.bf16 %v163_v44, %v160_v43  ;;  %v168_v49 = vld [vmem:[#allocation10 + $0x100] sm:$0xff]  ;;  %v166_v52 = vld [vmem:[#allocation10 + $0xf0] sm:$0xff] }
  0x65   :  { %652 = vmatpush3.bf16.msra.mxu1 %v651_v29  ;;  %v632_v50 = vpack.c.bf16 %v170_v46, %v167_v45  ;;  %v171_v51 = vld [vmem:[#allocation10 + $0x118] sm:$0xff]  ;;  %v169_v53 = vld [vmem:[#allocation10 + $0x108] sm:$0xff]  ;;  %v176_v55 = vld [vmem:[#allocation10 + $0x140] sm:$0xff] }
  0x66   :  { %623 = vmatpush1.bf16.msra.mxu0 %v622_v30  ;;  %653 = vmatprep.subr.bf16.mxu1 %v884_v0  ;;  %v173_v54 = vld [vmem:[#allocation10 + $0x128] sm:$0xff]  ;;  %v660_v56 = vpack.c.bf16 %v171_v51, %v168_v49  ;;  %v634_v57 = vpack.c.bf16 %v169_v53, %v166_v52  ;;  %v174_v58 = vld [vmem:[#allocation10 + $0x130] sm:$0xff]  ;;  %v172_v61 = vld [vmem:[#allocation10 + $0x120] sm:$0xff] }
  0x67   :  { %625 = vmatprep.subr.bf16.mxu0 %v624_v32  ;;  %v636_v59 = vpack.c.bf16 %v176_v55, %v173_v54  ;;  %v177_v60 = vld [vmem:[#allocation10 + $0x148] sm:$0xff]  ;;  %v175_v62 = vld [vmem:[#allocation10 + $0x138] sm:$0xff]  ;;  %v182_v2 = vld [vmem:[#allocation10 + $0x170] sm:$0xff] }
  0x68   :  { %v179_v63 = vld [vmem:[#allocation10 + $0x158] sm:$0xff]  ;;  %v663_v3 = vpack.c.bf16 %v177_v60, %v174_v58  ;;  %v638_v4 = vpack.c.bf16 %v175_v62, %v172_v61  ;;  %v180_v5 = vld [vmem:[#allocation10 + $0x160] sm:$0xff]  ;;  %v178_v8 = vld [vmem:[#allocation10 + $0x150] sm:$0xff] }
  0x69   :  { %655 = vmatpush3.bf16.msra.mxu1 %v654_v38  ;;  %v640_v6 = vpack.c.bf16 %v182_v2, %v179_v63  ;;  %v183_v7 = vld [vmem:[#allocation10 + $0x178] sm:$0xff]  ;;  %v181_v9 = vld [vmem:[#allocation10 + $0x168] sm:$0xff]  ;;  %v91_v11 = vld [vmem:[#allocation8 + $0x20] sm:$0xff] }
  0x6a   :  { %627 = vmatpush1.bf16.msra.mxu0 %v626_v39  ;;  %656 = vmatprep.subr.bf16.mxu1 %v884_v0  ;;  %v88_v10 = vld [vmem:[#allocation8 + $0x8] sm:$0xff]  ;;  %v666_v12 = vpack.c.bf16 %v183_v7, %v180_v5  ;;  %v642_v13 = vpack.c.bf16 %v181_v9, %v178_v8  ;;  %v89_v14 = vld [vmem:[#allocation8 + $0x10] sm:$0xff]  ;;  %v87_v17 = vld [vmem:[#allocation8] sm:$0xff] }
  0x6b   :  { %629 = vmatprep.subr.bf16.mxu0 %v628_v41  ;;  %v668_v15 = vpack.c.bf16 %v91_v11, %v88_v10  ;;  %v92_v16 = vld [vmem:[#allocation8 + $0x28] sm:$0xff]  ;;  %v90_v18 = vld [vmem:[#allocation8 + $0x18] sm:$0xff]  ;;  %v97_v20 = vld [vmem:[#allocation8 + $0x50] sm:$0xff] }
  0x6c   :  { %v94_v19 = vld [vmem:[#allocation8 + $0x38] sm:$0xff]  ;;  %v135_v21 = vld [vmem:[#allocation5] sm:$0xff]  ;;  %v701_v22 = vpack.c.bf16 %v92_v16, %v89_v14  ;;  %v670_v23 = vpack.c.bf16 %v90_v18, %v87_v17  ;;  %v95_v24 = vld [vmem:[#allocation8 + $0x40] sm:$0xff] }
  0x6d   :  { %658 = vmatpush3.bf16.msra.mxu1 %v657_v47  ;;  %v672_v25 = vpack.c.bf16 %v97_v20, %v94_v19  ;;  %v98_v26 = vld [vmem:[#allocation8 + $0x58] sm:$0xff]  ;;  %v93_v27 = vld [vmem:[#allocation8 + $0x30] sm:$0xff]  ;;  %v96_v28 = vld [vmem:[#allocation8 + $0x48] sm:$0xff] }
  0x6e   :  { %631 = vmatpush1.bf16.msra.mxu0 %v630_v48  ;;  %659 = vmatprep.subr.bf16.mxu1 %v884_v0  ;;  %v100_v29 = vld [vmem:[#allocation8 + $0x68] sm:$0xff]  ;;  %v103_v30 = vld [vmem:[#allocation8 + $0x80] sm:$0xff]  ;;  %v704_v31 = vpack.c.bf16 %v98_v26, %v95_v24  ;;  %v674_v32 = vpack.c.bf16 %v96_v28, %v93_v27  ;;  %v101_v33 = vld [vmem:[#allocation8 + $0x70] sm:$0xff] }
  0x6f   :  { %633 = vmatprep.subr.bf16.mxu0 %v632_v50  ;;  %v676_v34 = vpack.c.bf16 %v103_v30, %v100_v29  ;;  %v104_v35 = vld [vmem:[#allocation8 + $0x88] sm:$0xff]  ;;  %v99_v36 = vld [vmem:[#allocation8 + $0x60] sm:$0xff]  ;;  %v102_v37 = vld [vmem:[#allocation8 + $0x78] sm:$0xff] }
  0x70   :  { %v106_v38 = vld [vmem:[#allocation8 + $0x98] sm:$0xff]  ;;  %v109_v39 = vld [vmem:[#allocation8 + $0xb0] sm:$0xff]  ;;  %v707_v40 = vpack.c.bf16 %v104_v35, %v101_v33  ;;  %v678_v41 = vpack.c.bf16 %v102_v37, %v99_v36  ;;  %v107_v42 = vld [vmem:[#allocation8 + $0xa0] sm:$0xff] }
  0x71   :  { %661 = vmatpush3.bf16.msra.mxu1 %v660_v56  ;;  %v680_v43 = vpack.c.bf16 %v109_v39, %v106_v38  ;;  %v110_v44 = vld [vmem:[#allocation8 + $0xb8] sm:$0xff]  ;;  %v105_v45 = vld [vmem:[#allocation8 + $0x90] sm:$0xff]  ;;  %v108_v46 = vld [vmem:[#allocation8 + $0xa8] sm:$0xff] }
  0x72   :  { %635 = vmatpush1.bf16.msra.mxu0 %v634_v57  ;;  %662 = vmatprep.subr.bf16.mxu1 %v884_v0  ;;  %v112_v47 = vld [vmem:[#allocation8 + $0xc8] sm:$0xff]  ;;  %v115_v48 = vld [vmem:[#allocation8 + $0xe0] sm:$0xff]  ;;  %v710_v49 = vpack.c.bf16 %v110_v44, %v107_v42  ;;  %v682_v50 = vpack.c.bf16 %v108_v46, %v105_v45  ;;  %v113_v51 = vld [vmem:[#allocation8 + $0xd0] sm:$0xff] }
  0x73   :  { %637 = vmatprep.subr.bf16.mxu0 %v636_v59  ;;  %v116_v52 = vld [vmem:[#allocation8 + $0xe8] sm:$0xff]  ;;  %v111_v53 = vld [vmem:[#allocation8 + $0xc0] sm:$0xff]  ;;  %v114_v54 = vld [vmem:[#allocation8 + $0xd8] sm:$0xff] }
  0x74   :  { %v118_v55 = vld [vmem:[#allocation8 + $0xf8] sm:$0xff]  ;;  %v121_v56 = vld [vmem:[#allocation8 + $0x110] sm:$0xff]  ;;  %v713_v57 = vpack.c.bf16 %v116_v52, %v113_v51  ;;  %v686_v58 = vpack.c.bf16 %v114_v54, %v111_v53  ;;  %v119_v59 = vld [vmem:[#allocation8 + $0x100] sm:$0xff] }
  0x75   :  { %664 = vmatpush3.bf16.msra.mxu1 %v663_v3  ;;  %v688_v60 = vpack.c.bf16 %v121_v56, %v118_v55  ;;  %v122_v61 = vld [vmem:[#allocation8 + $0x118] sm:$0xff]  ;;  %v117_v62 = vld [vmem:[#allocation8 + $0xf0] sm:$0xff]  ;;  %v120_v63 = vld [vmem:[#allocation8 + $0x108] sm:$0xff] }
  0x76   :  { %639 = vmatpush1.bf16.msra.mxu0 %v638_v4  ;;  %665 = vmatprep.subr.bf16.mxu1 %v884_v0  ;;  %v124_v2 = vld [vmem:[#allocation8 + $0x128] sm:$0xff]  ;;  %v127_v3 = vld [vmem:[#allocation8 + $0x140] sm:$0xff]  ;;  %v716_v4 = vpack.c.bf16 %v122_v61, %v119_v59  ;;  %v690_v5 = vpack.c.bf16 %v120_v63, %v117_v62  ;;  %v126_v10 = vld [vmem:[#allocation8 + $0x138] sm:$0xff] }
  0x77   :  { %641 = vmatprep.subr.bf16.mxu0 %v640_v6  ;;  %v125_v6 = vld [vmem:[#allocation8 + $0x130] sm:$0xff]  ;;  %v692_v7 = vpack.c.bf16 %v127_v3, %v124_v2  ;;  %v128_v8 = vld [vmem:[#allocation8 + $0x148] sm:$0xff]  ;;  %v123_v9 = vld [vmem:[#allocation8 + $0x120] sm:$0xff] }
  0x78   :  { %v130_v11 = vld [vmem:[#allocation8 + $0x158] sm:$0xff]  ;;  %v694_v14 = vpack.c.bf16 %v126_v10, %v123_v9  ;;  %v129_v18 = vld [vmem:[#allocation8 + $0x150] sm:$0xff]  ;;  %v132_v19 = vld [vmem:[#allocation8 + $0x168] sm:$0xff] }
  0x79   :  { %667 = vmatpush3.bf16.msra.mxu1 %v666_v12  ;;  %v133_v12 = vld [vmem:[#allocation8 + $0x170] sm:$0xff]  ;;  %v134_v17 = vld [vmem:[#allocation8 + $0x178] sm:$0xff]  ;;  %v466_v28 = vld [vmem:[%s1038_s5] sm:$0x7]  ;;  %s847_s5 = scalar_lea.vmem %s498_s9, 128 }
  0x7a   :  { %643 = vmatpush1.bf16.msra.mxu0 %v642_v13  ;;  %700 = vmatprep.subr.bf16.mxu1 %v884_v0  ;;  %v719_v13 = vpack.c.bf16 %v128_v8, %v125_v6  ;;  %v696_v16 = vpack.c.bf16 %v133_v12, %v130_v11  ;;  %v486_v39 = vld [vmem:[#allocation7] sm:$0xff]  ;;  %p848_p12 = scmp.ne.s32.totalorder %s498_s9, %s847_s5  ;;  %p853_p0 = scmp.lt.s32.totalorder %s847_s5, %s847_s5 }
  0x7b   :  { %669 = vmatprep.subr.bf16.mxu0 %v668_v15  ;;  %v131_v15 = vld [vmem:[#allocation8 + $0x160] sm:$0xff] }
  0x7c   :  { %575 = vmatmul.mubr.f32.vlgmr.msra.gmra.mrb[0].mxu1 %v135_v21  ;;  %v722_v20 = vpack.c.bf16 %v134_v17, %v131_v15  ;;  %p854_p1 = por %p853_p0, %p852_p13 }
  0x7d   :  { %249 = vmatmul.mubr.f32.vlgmr.msra.gmra.mrb[0].mxu0 %v135_v21  ;;  %702 = vmatpush3.bf16.msra.mxu1 %v701_v22  ;;  %v698_v21 = vpack.c.bf16 %v132_v19, %v129_v18  ;;  %v86_v22 = vld [vmem:[#allocation2] sm:$0xff] }
  0x7e   :  { %671 = vmatpush1.bf16.msra.mxu0 %v670_v23  ;;  %703 = vmatprep.subr.bf16.mxu1 %v884_v0  ;;  %p855_p2 = pnand %p854_p1, %p848_p12 }
  0x7f   :  { %673 = vmatprep.subr.bf16.mxu0 %v672_v25  ;;  %609 = vmatprep.mubr.msk.f32.mxu1 %vm885_vm0, %v886_v1  ;;  %v468_v25 = vlaneseq }
  0x80   :  { %389 = vmatprep.mubr.f32.mxu0 %v886_v1  ;;  %v684_v1 = vpack.c.bf16 %v115_v48, %v112_v47 }
  0x81   :  { %705 = vmatpush3.bf16.msra.mxu1 %v704_v31  ;;  %v469_v26 = vshrl.u32 %v468_v25, 7 }
  0x82   :  { %675 = vmatpush1.bf16.msra.mxu0 %v674_v32  ;;  %706 = vmatprep.subr.bf16.mxu1 %v884_v0 }
  0x83   :  { %677 = vmatprep.subr.bf16.mxu0 %v676_v34  ;;  %v470_v27 = vsub.s32 0, %v469_v26  ;;  %v474_v29 = vsub.s32 1, %v469_v26  ;;  %v478_v30 = vsub.s32 2, %v469_v26 }
  0x85   :  { %708 = vmatpush3.bf16.msra.mxu1 %v707_v40  ;;  %v471_v31 = vrot.slane %v466_v28, %v470_v27  ;;  %v475_v32 = vrot.slane %v466_v28, %v474_v29 }
  0x86   :  { %679 = vmatpush1.bf16.msra.mxu0 %v678_v41  ;;  %709 = vmatprep.subr.bf16.mxu1 %v884_v0 }
  0x87   :  { %681 = vmatprep.subr.bf16.mxu0 %v680_v43 }
  0x89   :  { %711 = vmatpush3.bf16.msra.mxu1 %v710_v49 }
  0x8a   :  { %683 = vmatpush1.bf16.msra.mxu0 %v682_v50  ;;  %712 = vmatprep.subr.bf16.mxu1 %v884_v0 }
  0x8b   :  { %685 = vmatprep.subr.bf16.mxu0 %v684_v1 }
  0x8d   :  { %714 = vmatpush3.bf16.msra.mxu1 %v713_v57 }
  0x8e   :  { %687 = vmatpush1.bf16.msra.mxu0 %v686_v58  ;;  %715 = vmatprep.subr.bf16.mxu1 %v884_v0 }
  0x8f   :  { %689 = vmatprep.subr.bf16.mxu0 %v688_v60 }
  0x91   :  { %717 = vmatpush3.bf16.msra.mxu1 %v716_v4 }
  0x92   :  { %691 = vmatpush1.bf16.msra.mxu0 %v690_v5  ;;  %718 = vmatprep.subr.bf16.mxu1 %v884_v0 }
  0x93   :  { %693 = vmatprep.subr.bf16.mxu0 %v692_v7 }
  0x95   :  { %720 = vmatpush3.bf16.msra.mxu1 %v719_v13 }
  0x96   :  { %695 = vmatpush1.bf16.msra.mxu0 %v694_v14  ;;  %721 = vmatprep.subr.bf16.mxu1 %v884_v0  ;;  %v479_v0 = vrot.slane %v466_v28, %v478_v30 }
  0x97   :  { %697 = vmatprep.subr.bf16.mxu0 %v696_v16 }
  0x99   :  { %723 = vmatpush3.bf16.msra.mxu1 %v722_v20 }
  0x9a   :  { %699 = vmatpush1.bf16.msra.mxu0 %v698_v21 }
  0x9c   :  { %610 = vmatmul.mubr.f32.vlgmr.msra.gmra.mrb[2].mxu1 %v86_v22 }
  0x9d   :  { %390 = vmatmul.mubr.f32.vlgmr.msra.gmra.mrb[0].mxu0 %v86_v22 }
 0x14f   :  { %v321_v23 = vpop.f32.mrb[0].mxu1 }
 0x150   :  { %v576_v24 = vpop.f32.mrb[1].mxu1 }
 0x16f   :  { %v462_v33 = vpop.f32.mrb[2].mxu1 }
 0x170   :  { %v391_v34 = vpop.f32.mrb[0].mxu0  ;;  %v463_v35 = vadd.f32 %v462_v33, %v321_v23  ;;  %v611_v37 = vpop.f32.mrb[3].mxu1 }
 0x171   :  { %v483_v36 = vadd.f32 %v471_v31, %v391_v34  ;;  %v393_v38 = vpop.f32.mrb[1].mxu0 }
 0x172   :  { %v484_v40 = vadd.f32 %v475_v32, %v393_v38  ;;  %v485_v41 = vadd.f32 %v479_v0, %v463_v35 }
 0x174   :  { %v487_v42 = vmul.f32 %v484_v40, %v483_v36  ;;  %v488_v43 = vmul.f32 %v486_v39, %v485_v41 }
 0x176   :  { %v489_v44 = vadd.f32 %v488_v43, %v487_v42 }
 0x178   :  { %490 = vst [vmem:[#allocation11] sm:$0xff] %v489_v44 }
 0x179   :  { %858 = shalt.err (!%p855_p2)
}
 0x17a   :  { %s859_s10 = scalar_lea.hbm %s1039_s6, 128 }
 0x17b   :  { %p860_p3 = scmp.ne.s32.totalorder %s1039_s6, %s859_s10  ;;  %p863_p4 = scmp.lt.u32.totalorder %s859_s10, %s1039_s6 }
 0x17d   :  { %p865_p5 = pnand %p863_p4, %p860_p3 }
 0x17f   :  { %868 = shalt.err (!%p865_p5)
}
 0x180   :  { %500 = dma.vmem_to_hbm [thread:$0]  %s498_s9, 128, %s1039_s6, [#allocation4]  }
 0x181   :  { %875 = dma.done.wait [#allocation4], 128  }
 0x182   :  { %876 = vsyncadd [#allocation4], 4294967168 }
 0x183   :  { %504 = vsyncpa [#allocation3], 1 }
 0x184   :  { %505 = vsyncpa [#allocation6], 1 }
 0x185   :  { %506 = vsyncpa [#allocation9], 1 }
 0x186   :  { %507 = vsyncpa [#allocation4], 1 }

</bundles_post_ra>
